<compile_context>
chip_gen: v5e
topology: v5e:2x2
jax: 0.10.0
libtpu: 0.0.40
codegen_flags: <defaults>
</compile_context>

<pallas_src>
import jax
import jax.numpy as jnp
import numpy as np
from jax.experimental import pallas as pl
from jax.experimental.pallas import tpu as pltpu

PARAM_ORDER = ("w1", "b1", "w2", "b2")
OUT_W = 128  # lane-dense output width (unmasked vst on writeback)


def _round_up(a, m):
    return ((a + m - 1) // m) * m


def trace_fim_kernel(x_ref, gum_ref, w1_ref, b1_ref, w2_ref, b2_ref, out_ref):
    x = x_ref[...].astype(jnp.float32)               # [TB, D]
    s_x = jnp.sum(x * x, axis=-1, keepdims=True)     # compute early: x dies after fwd matmul

    w1 = w1_ref[...]                                 # [D, H]
    b1 = b1_ref[...]                                 # [1, H]
    w2 = w2_ref[...]                                 # [H, C]
    b2 = b2_ref[...]                                 # [1, C]

    # ---- forward (eval mode, no dropout/BN) ----
    h = jnp.maximum(jnp.dot(x, w1, preferred_element_type=jnp.float32) + b1, 0.0)  # [TB, H]
    logits = jnp.dot(h, w2, preferred_element_type=jnp.float32) + b2               # [TB, C]
    TB, C = logits.shape

    # ---- sample labels ~ Categorical(softmax(logits)) via Gumbel-max ----
    z = logits + gum_ref[...]
    zmax = jnp.max(z, axis=-1, keepdims=True)
    lane = jax.lax.broadcasted_iota(jnp.int32, (TB, C), 1)
    cand = jnp.where(z >= zmax, lane, C)                  # argmax w/ first-hit tiebreak
    sampled = jnp.min(cand, axis=-1, keepdims=True)       # [TB, 1] int32
    onehot = (lane == sampled).astype(jnp.float32)        # [TB, C]

    # ---- softmax & dL/dlogits for CE with the sampled (detached) label ----
    lmax = jnp.max(logits, axis=-1, keepdims=True)
    e = jnp.exp(logits - lmax)
    p = e / jnp.sum(e, axis=-1, keepdims=True)
    g = p - onehot                                        # [TB, C]

    # ---- backprop through layer 2 into layer 1 pre-activation ----
    # Contract on the class axis of both g [TB,C] and w2 [H,C]: no transposed copy needed.
    dh = jax.lax.dot_general(g, w2, dimension_numbers=(((1,), (1,)), ((), ())),
                             preferred_element_type=jnp.float32)                   # [TB, H]
    dh_pre = dh * (h > 0.0).astype(jnp.float32)           # relu mask: h>0 <=> h_pre>0

    # ---- per-sample squared gradient norms per parameter (rank-1 trick) ----
    s_g = jnp.sum(g * g, axis=-1, keepdims=True)          # ||dL/db2||^2
    s_h = jnp.sum(h * h, axis=-1, keepdims=True)
    s_d1 = jnp.sum(dh_pre * dh_pre, axis=-1, keepdims=True)  # ||dL/db1||^2

    n_w1 = s_x * s_d1        # ||dL/dW1||^2
    n_b1 = s_d1
    n_w2 = s_h * s_g         # ||dL/dW2||^2
    n_b2 = s_g

    # ---- single lane-dense output block: cols 0..3 = norms, col 4 = label ----
    col = jax.lax.broadcasted_iota(jnp.int32, (TB, OUT_W), 1)
    out = (jnp.where(col == 0, n_w1, 0.0)
           + jnp.where(col == 1, n_b1, 0.0)
           + jnp.where(col == 2, n_w2, 0.0)
           + jnp.where(col == 3, n_b2, 0.0)
           + jnp.where(col == 4, sampled.astype(jnp.float32), 0.0))
    out_ref[...] = out


def trace_fim_per_sample_norms(x, params, seed, max_tile_b=256):
    """Returns ([B, 4] per-sample squared grad norms, [B] sampled labels)."""
    B, D = x.shape
    w1, b1, w2, b2 = params["w1"], params["b1"], params["w2"], params["b2"]
    H = w1.shape[1]
    C = w2.shape[1]

    # Large batch tiles (>= 8 rows, multiple of 8); pad B so no remainder is dropped.
    tile = min(max_tile_b, _round_up(B, 8))
    B_pad = _round_up(B, tile)
    x_in = x if B_pad == B else jnp.zeros((B_pad, D), x.dtype).at[:B, :].set(x)

    # Gumbel noise generated outside the kernel (portable; exact categorical sampling).
    gumbel = jax.random.gumbel(jax.random.PRNGKey(seed), (B_pad, C), dtype=jnp.float32)

    grid_spec = pltpu.PrefetchScalarGridSpec(
        num_scalar_prefetch=0,
        grid=(B_pad // tile,),
        in_specs=[
            pl.BlockSpec((tile, D), lambda i: (i, 0)),
            pl.BlockSpec((tile, C), lambda i: (i, 0)),
            pl.BlockSpec((D, H), lambda i: (0, 0)),   # weights stay VMEM-resident
            pl.BlockSpec((1, H), lambda i: (0, 0)),
            pl.BlockSpec((H, C), lambda i: (0, 0)),
            pl.BlockSpec((1, C), lambda i: (0, 0)),
        ],
        out_specs=pl.BlockSpec((tile, OUT_W), lambda i: (i, 0)),
    )
    out = pl.pallas_call(
        trace_fim_kernel,
        out_shape=jax.ShapeDtypeStruct((B_pad, OUT_W), jnp.float32),
        grid_spec=grid_spec,
        compiler_params=pltpu.CompilerParams(
            dimension_semantics=("parallel",)),  # independent tiles -> dual-TC on v7x
    )(x_in, gumbel, w1, b1, w2, b2)

    norms = out[:B, :4]
    labels = out[:B, 4].astype(jnp.int32)
    return norms, labels


def trace_fim_forward(step, x, params, seed):
    """Mirrors TraceFIMbackup.forward: returns the evaluators dict (+ sampled labels)."""
    norms, labels = trace_fim_per_sample_norms(x, params, seed)
    B = x.shape[0]
    per_param = np.asarray(norms.sum(axis=0) / B)   # single device->host transfer
    evaluators = {}
    overall = 0.0
    for i, name in enumerate(PARAM_ORDER):
        t = float(per_param[i])
        evaluators[f"trace_fim/{name}"] = t
        overall += t                                # all params are "penalized"
    evaluators["trace_fim/overall_trace"] = overall
    evaluators["steps/trace_fim"] = step
    return evaluators, labels


if __name__ == "__main__":
    B, D, H, C = 16, 32, 64, 16
    key = jax.random.PRNGKey(0)
    kx, k1, k2, k3, k4 = jax.random.split(key, 5)
    x = jax.random.normal(kx, (B, D), dtype=jnp.float32)
    lim1 = 1.0 / np.sqrt(D)
    lim2 = 1.0 / np.sqrt(H)
    params = {
        "w1": jax.random.uniform(k1, (D, H), jnp.float32, -lim1, lim1),
        "b1": jax.random.uniform(k2, (1, H), jnp.float32, -lim1, lim1),
        "w2": jax.random.uniform(k3, (H, C), jnp.float32, -lim2, lim2),
        "b2": jax.random.uniform(k4, (1, C), jnp.float32, -lim2, lim2),
    }

    evaluators, labels = trace_fim_forward(step=0, x=x, params=params, seed=1234)
    labels = jax.block_until_ready(labels)

    # Pure-JAX reference (vmap(grad)) using the labels sampled inside the kernel.
    def model_apply(p, xs):
        h = jnp.maximum(xs @ p["w1"] + p["b1"][0], 0.0)
        return h @ p["w2"] + p["b2"][0]

    def loss_fn(p, xs, y):
        return -jax.nn.log_softmax(model_apply(p, xs))[y]

    grads = jax.vmap(jax.grad(loss_fn), in_axes=(None, 0, 0))(params, x, labels)
    ref = {k: float((g ** 2).sum() / B) for k, g in grads.items()}
    ref_overall = sum(ref.values())

    for name in PARAM_ORDER:
        np.testing.assert_allclose(evaluators[f"trace_fim/{name}"], ref[name],
                                   rtol=1e-4, atol=1e-5)
    np.testing.assert_allclose(evaluators["trace_fim/overall_trace"],
                               ref_overall, rtol=1e-4, atol=1e-5)
    print("KERNEL_OK")
</pallas_src>

<mosaic_0001>
module attributes {stable_mosaic.version = 11 : i64} {
  func.func @trace_fim_kernel(%arg0: i32, %arg1: memref<16x32xf32, #tpu.memory_space<vmem>>, %arg2: memref<16x16xf32, #tpu.memory_space<vmem>>, %arg3: memref<32x64xf32, #tpu.memory_space<vmem>>, %arg4: memref<1x64xf32, #tpu.memory_space<vmem>>, %arg5: memref<64x16xf32, #tpu.memory_space<vmem>>, %arg6: memref<1x16xf32, #tpu.memory_space<vmem>>, %arg7: memref<16x128xf32, #tpu.memory_space<vmem>>) attributes {dimension_semantics = [#tpu.dimension_semantics<parallel>], iteration_bounds = array<i64: 1>, scalar_prefetch = 0 : i64, scratch_operands = 0 : i64, tpu.core_type = #tpu.core_type<tc>, window_params = [{transform_indices = @transform_0, window_bounds = array<i64: 16, 32>}, {transform_indices = @transform_1, window_bounds = array<i64: 16, 16>}, {pipeline_mode = #tpu.pipeline_mode<synchronous>, transform_indices = @transform_2, window_bounds = array<i64: 32, 64>}, {pipeline_mode = #tpu.pipeline_mode<synchronous>, transform_indices = @transform_3, window_bounds = array<i64: 1, 64>}, {pipeline_mode = #tpu.pipeline_mode<synchronous>, transform_indices = @transform_4, window_bounds = array<i64: 64, 16>}, {pipeline_mode = #tpu.pipeline_mode<synchronous>, transform_indices = @transform_5, window_bounds = array<i64: 1, 16>}, {transform_indices = @transform_6, window_bounds = array<i64: 16, 128>}]} {
    %c0 = arith.constant 0 : index
    %c0_0 = arith.constant 0 : index
    %0 = vector.load %arg1[%c0, %c0_0] : memref<16x32xf32, #tpu.memory_space<vmem>>, vector<16x32xf32>
    %1 = arith.mulf %0, %0 : vector<16x32xf32>
    %cst = arith.constant dense<0.000000e+00> : vector<16xf32>
    %2 = vector.multi_reduction <add>, %1, %cst [1] : vector<16x32xf32> to vector<16xf32>
    %3 = vector.shape_cast %2 : vector<16xf32> to vector<16x1xf32>
    %c0_1 = arith.constant 0 : index
    %c0_2 = arith.constant 0 : index
    %4 = vector.load %arg3[%c0_1, %c0_2] : memref<32x64xf32, #tpu.memory_space<vmem>>, vector<32x64xf32>
    %c0_3 = arith.constant 0 : index
    %c0_4 = arith.constant 0 : index
    %5 = vector.load %arg4[%c0_3, %c0_4] : memref<1x64xf32, #tpu.memory_space<vmem>>, vector<1x64xf32>
    %c0_5 = arith.constant 0 : index
    %c0_6 = arith.constant 0 : index
    %6 = vector.load %arg5[%c0_5, %c0_6] : memref<64x16xf32, #tpu.memory_space<vmem>>, vector<64x16xf32>
    %c0_7 = arith.constant 0 : index
    %c0_8 = arith.constant 0 : index
    %7 = vector.load %arg6[%c0_7, %c0_8] : memref<1x16xf32, #tpu.memory_space<vmem>>, vector<1x16xf32>
    %cst_9 = arith.constant dense<0.000000e+00> : vector<16x64xf32>
    %8 = tpu.matmul %0, %4, %cst_9 {dimension_numbers = #tpu.dot_dimension_numbers<[1], [0], [0], [1], [0, 0, 1, 1], [], []>} : vector<16x32xf32>, vector<32x64xf32>, vector<16x64xf32> -> vector<16x64xf32>
    %9 = vector.broadcast %5 : vector<1x64xf32> to vector<16x64xf32>
    %10 = arith.addf %8, %9 : vector<16x64xf32>
    %cst_10 = arith.constant 0.000000e+00 : f32
    %11 = vector.broadcast %cst_10 : f32 to vector<16x64xf32>
    %12 = arith.maximumf %10, %11 : vector<16x64xf32>
    %cst_11 = arith.constant dense<0.000000e+00> : vector<16x16xf32>
    %13 = tpu.matmul %12, %6, %cst_11 {dimension_numbers = #tpu.dot_dimension_numbers<[1], [0], [0], [1], [0, 0, 1, 1], [], []>} : vector<16x64xf32>, vector<64x16xf32>, vector<16x16xf32> -> vector<16x16xf32>
    %14 = vector.broadcast %7 : vector<1x16xf32> to vector<16x16xf32>
    %15 = arith.addf %13, %14 : vector<16x16xf32>
    %c0_12 = arith.constant 0 : index
    %c0_13 = arith.constant 0 : index
    %16 = vector.load %arg2[%c0_12, %c0_13] : memref<16x16xf32, #tpu.memory_space<vmem>>, vector<16x16xf32>
    %17 = arith.addf %15, %16 : vector<16x16xf32>
    %cst_14 = arith.constant dense<0xFF800000> : vector<16xf32>
    %18 = vector.multi_reduction <maximumf>, %17, %cst_14 [1] : vector<16x16xf32> to vector<16xf32>
    %19 = vector.shape_cast %18 : vector<16xf32> to vector<16x1xf32>
    %20 = tpu.iota {dimensions = array<i32: 1>} : vector<16x16xi32>
    %21 = vector.broadcast %19 : vector<16x1xf32> to vector<16x16xf32>
    %22 = arith.cmpf oge, %17, %21 : vector<16x16xf32>
    %c16_i32 = arith.constant 16 : i32
    %23 = vector.broadcast %c16_i32 : i32 to vector<16x16xi32>
    %24 = arith.select %22, %20, %23 : vector<16x16xi1>, vector<16x16xi32>
    %cst_15 = arith.constant dense<2147483647> : vector<16xi32>
    %25 = vector.multi_reduction <minsi>, %24, %cst_15 [1] : vector<16x16xi32> to vector<16xi32>
    %26 = vector.shape_cast %25 : vector<16xi32> to vector<16x1xi32>
    %27 = vector.broadcast %26 : vector<16x1xi32> to vector<16x16xi32>
    %28 = arith.cmpi eq, %20, %27 : vector<16x16xi32>
    %29 = arith.extui %28 : vector<16x16xi1> to vector<16x16xi32>
    %30 = arith.sitofp %29 : vector<16x16xi32> to vector<16x16xf32>
    %cst_16 = arith.constant dense<0xFF800000> : vector<16xf32>
    %31 = vector.multi_reduction <maximumf>, %15, %cst_16 [1] : vector<16x16xf32> to vector<16xf32>
    %32 = vector.shape_cast %31 : vector<16xf32> to vector<16x1xf32>
    %33 = vector.broadcast %32 : vector<16x1xf32> to vector<16x16xf32>
    %34 = arith.subf %15, %33 : vector<16x16xf32>
    %35 = math.exp %34 : vector<16x16xf32>
    %cst_17 = arith.constant dense<0.000000e+00> : vector<16xf32>
    %36 = vector.multi_reduction <add>, %35, %cst_17 [1] : vector<16x16xf32> to vector<16xf32>
    %37 = vector.shape_cast %36 : vector<16xf32> to vector<16x1xf32>
    %38 = vector.broadcast %37 : vector<16x1xf32> to vector<16x16xf32>
    %39 = arith.divf %35, %38 : vector<16x16xf32>
    %40 = arith.subf %39, %30 : vector<16x16xf32>
    %cst_18 = arith.constant dense<0.000000e+00> : vector<16x64xf32>
    %41 = tpu.matmul %40, %6, %cst_18 {dimension_numbers = #tpu.dot_dimension_numbers<[1], [1], [0], [0], [0, 0, 1, 0], [], []>} : vector<16x16xf32>, vector<64x16xf32>, vector<16x64xf32> -> vector<16x64xf32>
    %cst_19 = arith.constant 0.000000e+00 : f32
    %42 = vector.broadcast %cst_19 : f32 to vector<16x64xf32>
    %43 = arith.cmpf ogt, %12, %42 : vector<16x64xf32>
    %44 = arith.extui %43 : vector<16x64xi1> to vector<16x64xi32>
    %45 = arith.sitofp %44 : vector<16x64xi32> to vector<16x64xf32>
    %46 = arith.mulf %41, %45 : vector<16x64xf32>
    %47 = arith.mulf %40, %40 : vector<16x16xf32>
    %cst_20 = arith.constant dense<0.000000e+00> : vector<16xf32>
    %48 = vector.multi_reduction <add>, %47, %cst_20 [1] : vector<16x16xf32> to vector<16xf32>
    %49 = vector.shape_cast %48 : vector<16xf32> to vector<16x1xf32>
    %50 = arith.mulf %12, %12 : vector<16x64xf32>
    %cst_21 = arith.constant dense<0.000000e+00> : vector<16xf32>
    %51 = vector.multi_reduction <add>, %50, %cst_21 [1] : vector<16x64xf32> to vector<16xf32>
    %52 = vector.shape_cast %51 : vector<16xf32> to vector<16x1xf32>
    %53 = arith.mulf %46, %46 : vector<16x64xf32>
    %cst_22 = arith.constant dense<0.000000e+00> : vector<16xf32>
    %54 = vector.multi_reduction <add>, %53, %cst_22 [1] : vector<16x64xf32> to vector<16xf32>
    %55 = vector.shape_cast %54 : vector<16xf32> to vector<16x1xf32>
    %56 = arith.mulf %3, %55 : vector<16x1xf32>
    %57 = arith.mulf %52, %49 : vector<16x1xf32>
    %58 = tpu.iota {dimensions = array<i32: 1>} : vector<16x128xi32>
    %c0_i32 = arith.constant 0 : i32
    %59 = vector.broadcast %c0_i32 : i32 to vector<16x128xi32>
    %60 = arith.cmpi eq, %58, %59 : vector<16x128xi32>
    %cst_23 = arith.constant 0.000000e+00 : f32
    %61 = vector.shape_cast %56 : vector<16x1xf32> to vector<16x1xf32>
    %62 = vector.broadcast %61 : vector<16x1xf32> to vector<16x128xf32>
    %63 = vector.broadcast %cst_23 : f32 to vector<16x128xf32>
    %64 = arith.select %60, %62, %63 : vector<16x128xi1>, vector<16x128xf32>
    %c1_i32 = arith.constant 1 : i32
    %65 = vector.broadcast %c1_i32 : i32 to vector<16x128xi32>
    %66 = arith.cmpi eq, %58, %65 : vector<16x128xi32>
    %cst_24 = arith.constant 0.000000e+00 : f32
    %67 = vector.shape_cast %55 : vector<16x1xf32> to vector<16x1xf32>
    %68 = vector.broadcast %67 : vector<16x1xf32> to vector<16x128xf32>
    %69 = vector.broadcast %cst_24 : f32 to vector<16x128xf32>
    %70 = arith.select %66, %68, %69 : vector<16x128xi1>, vector<16x128xf32>
    %71 = arith.addf %64, %70 : vector<16x128xf32>
    %c2_i32 = arith.constant 2 : i32
    %72 = vector.broadcast %c2_i32 : i32 to vector<16x128xi32>
    %73 = arith.cmpi eq, %58, %72 : vector<16x128xi32>
    %cst_25 = arith.constant 0.000000e+00 : f32
    %74 = vector.shape_cast %57 : vector<16x1xf32> to vector<16x1xf32>
    %75 = vector.broadcast %74 : vector<16x1xf32> to vector<16x128xf32>
    %76 = vector.broadcast %cst_25 : f32 to vector<16x128xf32>
    %77 = arith.select %73, %75, %76 : vector<16x128xi1>, vector<16x128xf32>
    %78 = arith.addf %71, %77 : vector<16x128xf32>
    %c3_i32 = arith.constant 3 : i32
    %79 = vector.broadcast %c3_i32 : i32 to vector<16x128xi32>
    %80 = arith.cmpi eq, %58, %79 : vector<16x128xi32>
    %cst_26 = arith.constant 0.000000e+00 : f32
    %81 = vector.shape_cast %49 : vector<16x1xf32> to vector<16x1xf32>
    %82 = vector.broadcast %81 : vector<16x1xf32> to vector<16x128xf32>
    %83 = vector.broadcast %cst_26 : f32 to vector<16x128xf32>
    %84 = arith.select %80, %82, %83 : vector<16x128xi1>, vector<16x128xf32>
    %85 = arith.addf %78, %84 : vector<16x128xf32>
    %c4_i32 = arith.constant 4 : i32
    %86 = vector.broadcast %c4_i32 : i32 to vector<16x128xi32>
    %87 = arith.cmpi eq, %58, %86 : vector<16x128xi32>
    %88 = arith.sitofp %26 : vector<16x1xi32> to vector<16x1xf32>
    %cst_27 = arith.constant 0.000000e+00 : f32
    %89 = vector.shape_cast %88 : vector<16x1xf32> to vector<16x1xf32>
    %90 = vector.broadcast %89 : vector<16x1xf32> to vector<16x128xf32>
    %91 = vector.broadcast %cst_27 : f32 to vector<16x128xf32>
    %92 = arith.select %87, %90, %91 : vector<16x128xi1>, vector<16x128xf32>
    %93 = arith.addf %85, %92 : vector<16x128xf32>
    %c0_28 = arith.constant 0 : index
    %c0_29 = arith.constant 0 : index
    %94 = vector.load %arg7[%c0_28, %c0_29] : memref<16x128xf32, #tpu.memory_space<vmem>>, vector<16x128xf32>
    tpu.vector_store %arg7[%c0_28, %c0_29], %93 {strides = array<i32>} : memref<16x128xf32, #tpu.memory_space<vmem>>, vector<16x128xf32>,
    return
  }
  func.func @transform_0(%arg0: i32) -> (i32, i32) {
    %c0_i32 = arith.constant 0 : i32
    %c0_i32_0 = arith.constant 0 : i32
    return %arg0, %c0_i32 : i32, i32
  }
  func.func @transform_1(%arg0: i32) -> (i32, i32) {
    %c0_i32 = arith.constant 0 : i32
    %c0_i32_0 = arith.constant 0 : i32
    return %arg0, %c0_i32 : i32, i32
  }
  func.func @transform_2(%arg0: i32) -> (i32, i32) {
    %c0_i32 = arith.constant 0 : i32
    %c0_i32_0 = arith.constant 0 : i32
    %c0_i32_1 = arith.constant 0 : i32
    return %c0_i32, %c0_i32_0 : i32, i32
  }
  func.func @transform_3(%arg0: i32) -> (i32, i32) {
    %c0_i32 = arith.constant 0 : i32
    %c0_i32_0 = arith.constant 0 : i32
    %c0_i32_1 = arith.constant 0 : i32
    return %c0_i32, %c0_i32_0 : i32, i32
  }
  func.func @transform_4(%arg0: i32) -> (i32, i32) {
    %c0_i32 = arith.constant 0 : i32
    %c0_i32_0 = arith.constant 0 : i32
    %c0_i32_1 = arith.constant 0 : i32
    return %c0_i32, %c0_i32_0 : i32, i32
  }
  func.func @transform_5(%arg0: i32) -> (i32, i32) {
    %c0_i32 = arith.constant 0 : i32
    %c0_i32_0 = arith.constant 0 : i32
    %c0_i32_1 = arith.constant 0 : i32
    return %c0_i32, %c0_i32_0 : i32, i32
  }
  func.func @transform_6(%arg0: i32) -> (i32, i32) {
    %c0_i32 = arith.constant 0 : i32
    %c0_i32_0 = arith.constant 0 : i32
    return %arg0, %c0_i32 : i32, i32
  }
}

</mosaic_0001>

<bundles_post_ra>
// kernel: tpu_custom_call.1
= control target key start
LH: loop header
LB: loop body
LE: loop exit
PB: predicated region body
PF: predicated region fallthrough
CT: control target
= control target key end

     0   :  { %s614_s0 = inlined_call_operand.vmem [shape: f32[16,32], index: 0, kind: input, shape index: {}]   ;;  %s615_s1 = inlined_call_operand.vmem [shape: f32[16,16], index: 1, kind: input, shape index: {}]   ;;  %s616_s2 = inlined_call_operand.vmem [shape: f32[32,64], index: 2, kind: input, shape index: {}]   ;;  %s617_s3 = inlined_call_operand.vmem [shape: f32[1,64], index: 3, kind: input, shape index: {}]   ;;  %s618_s4 = inlined_call_operand.vmem [shape: f32[64,16], index: 4, kind: input, shape index: {}]   ;;  %s619_s5 = inlined_call_operand.vmem [shape: f32[1,16], index: 5, kind: input, shape index: {}]   ;;  %s620_s6 = inlined_call_operand.hbm [shape: f32[16,128], index: 6, kind: output, shape index: {}]  }
   0x1   :  { %v38_v0 = vld [vmem:[%s616_s2 + $0x18] sm:$0xff]  ;;  %v37_v1 = vld [vmem:[%s616_s2 + $0x10] sm:$0xff]  ;;  %v36_v2 = vld [vmem:[%s616_s2 + $0x8] sm:$0xff] }
   0x2   :  { %70 = vmatpush.msra.mxu0 %v38_v0  ;;  %v47_v3 = vld [vmem:[%s618_s4 + $0x38] sm:$0xff]  ;;  %v46_v4 = vld [vmem:[%s618_s4 + $0x30] sm:$0xff]  ;;  %v35_v5 = vld [vmem:[%s616_s2] sm:$0xff] }
   0x3   :  { %101 = vmatpush.msra.mxu1 %v47_v3  ;;  %v45_v6 = vld [vmem:[%s618_s4 + $0x28] sm:$0xff] }
   0x4   :  { %71 = vmatpush.msra.mxu0 %v37_v1 }
   0x5   :  { %11 = vsyncpa [#allocation3], 0  ;;  %v482_v7 = vld [vmem:[%s614_s0] sm:$0xff]  ;;  %vm28_vm0 = vcmask 261120   ;;  %102 = vmatpush.msra.mxu1 %v46_v4  ;;  %v43_v9 = vld [vmem:[%s618_s4 + $0x18] sm:$0xff]  ;;  %vm86_vm1 = vcmask 523264   ;;  %v127_v34 = vlaneseq }
   0x6   :  { %72 = vmatpush.msra.mxu0 %v36_v2  ;;  %v44_v8 = vld [vmem:[%s618_s4 + $0x20] sm:$0xff]  ;;  %v495_v10 = vld [vmem:[%s614_s0 + $0x8] sm:$0xff]  ;;  %v42_v11 = vld [vmem:[%s618_s4 + $0x10] sm:$0xff]  ;;  %vm120_vm2 = vcmask 130048   ;;  %s341_s7 = sshll.u32 %s620_s6, 4  ;;  %s421_s8 = smov 128   ;;  %s342_s7 = int_to_ptr.hbm [resolvable:$true] %s341_s7 }
   0x7   :  { %103 = vmatpush.msra.mxu1 %v45_v6  ;;  %v41_v12 = vld [vmem:[%s618_s4 + $0x8] sm:$0xff]  ;;  %v40_v13 = vld [vmem:[%s618_s4] sm:$0xff]  ;;  %359 = vmatpush.xpose.msk.msra.mxu2 %vm120_vm2, %v47_v3  ;;  %v548_v36 = vand.u32 127, %v127_v34  ;;  %v27_v0 = vmul.f32 %v495_v10, %v495_v10  ;;  %s422_s9 = smov 8  }
   0x8   :  { %73 = vmatpush.msra.mxu0 %v35_v5  ;;  %v383_v14 = vld [vmem:[%s617_s3] ss:$0 sm:$0xff]  ;;  %371 = vmatpush.xpose.msk.msra.mxu3 %vm120_vm2, %v47_v3  ;;  %v117_v29 = vld [vmem:[%s615_s1 + $0x8] sm:$0xff] }
   0x9   :  { %353 = vmatmul.msk.f32.vlgmr.msra.gmra.mxu0 %vm28_vm0, %v482_v7  ;;  %104 = vmatpush.msra.mxu1 %v44_v8  ;;  %v384_v21 = vld [vmem:[%s619_s5] ss:$0 sm:$0xff]  ;;  %v32_v2 = vsel %vm28_vm0, %v27_v0, 0.0 }
   0xa   :  { %v116_v23 = vld [vmem:[%s615_s1] sm:$0xff]  ;;  %s420_s1 = smov [#allocation2]  }
   0xb   :  { %105 = vmatpush.msra.mxu1 %v43_v9  ;;  %360 = vmatpush.xpose.msk.msra.mxu2 %vm120_vm2, %v46_v4  ;;  %s339_s28 = sshll.u32 %s420_s1, 4  ;;  %s340_s28 = int_to_ptr.vmem [resolvable:$true] %s339_s28 }
   0xc   :  { %372 = vmatpush.xpose.msk.msra.mxu3 %vm120_vm2, %v46_v4 }
   0xd   :  { %106 = vmatpush.msra.mxu1 %v42_v11 }
   0xf   :  { %107 = vmatpush.msra.mxu1 %v41_v12  ;;  %361 = vmatpush.xpose.msk.msra.mxu2 %vm120_vm2, %v45_v6 }
  0x10   :  { %373 = vmatpush.xpose.msk.msra.mxu3 %vm120_vm2, %v45_v6 }
  0x11   :  { %354 = vmatmul.msk.f32.gmra.mxu0 %vm28_vm0, %v495_v10  ;;  %108 = vmatpush.msra.mxu1 %v40_v13 }
  0x13   :  { %362 = vmatpush.xpose.msk.msra.mxu2 %vm120_vm2, %v44_v8 }
  0x14   :  { %374 = vmatpush.xpose.msk.msra.mxu3 %vm120_vm2, %v44_v8 }
  0x17   :  { %363 = vmatpush.xpose.msk.msra.mxu2 %vm120_vm2, %v43_v9 }
  0x18   :  { %375 = vmatpush.xpose.msk.msra.mxu3 %vm120_vm2, %v43_v9 }
  0x1b   :  { %364 = vmatpush.xpose.msk.msra.mxu2 %vm120_vm2, %v42_v11 }
  0x1c   :  { %376 = vmatpush.xpose.msk.msra.mxu3 %vm120_vm2, %v42_v11 }
  0x1f   :  { %365 = vmatpush.xpose.msk.msra.mxu2 %vm120_vm2, %v41_v12 }
  0x20   :  { %377 = vmatpush.xpose.msk.msra.mxu3 %vm120_vm2, %v41_v12 }
  0x23   :  { %366 = vmatpush.xpose.msk.msra.mxu2 %vm120_vm2, %v40_v13 }
  0x24   :  { %378 = vmatpush.xpose.msk.msra.mxu3 %vm120_vm2, %v40_v13 }
  0x86   :  { %v75_v15 = vpop.f32.mrf.mxu0 }
  0x87   :  { %v76_v16 = vadd.f32 %v383_v14, %v75_v15 }
  0x89   :  { %v511_v17 = vmax.f32 %v76_v16, 0.0 }
  0x8b   :  { %355 = vmatmul.msk.f32.vlgmr.msra.gmra.mxu1 %vm86_vm1, %v511_v17 }
  0x8e   :  { %v78_v18 = vpop.f32.mrf.mxu0 }
  0x8f   :  { %v79_v19 = vadd.f32 %v383_v14, %v78_v18 }
  0x91   :  { %v515_v20 = vmax.f32 %v79_v19, 0.0 }
  0x93   :  { %356 = vmatmul.msk.f32.gmra.mxu1 %vm86_vm1, %v515_v20 }
 0x108   :  { %v110_v22 = vpop.f32.mrf.mxu1 }
 0x109   :  { %v111_v24 = vadd.f32 %v384_v21, %v110_v22 }
 0x10b   :  { %v169_v25 = vsel %vm120_vm2, %v111_v24, -inf  ;;  %v118_v26 = vadd.f32 %v116_v23, %v111_v24 }
 0x10c   :  { %170 = vmax.xlane.f32.xlu1 %v169_v25 }
 0x10d   :  { %v121_v27 = vsel %vm120_vm2, %v118_v26, -inf }
 0x10e   :  { %122 = vmax.xlane.f32.xlu0 %v121_v27 }
 0x110   :  { %v113_v28 = vpop.f32.mrf.mxu1 }
 0x111   :  { %v114_v30 = vadd.f32 %v384_v21, %v113_v28 }
 0x113   :  { %v172_v31 = vsel %vm120_vm2, %v114_v30, -inf  ;;  %v119_v32 = vadd.f32 %v117_v29, %v114_v30 }
 0x114   :  { %173 = vmax.xlane.f32.xlu1 %v172_v31  ;;  %v419_v31 = vmov 0.0  }
 0x115   :  { %v124_v33 = vsel %vm120_vm2, %v119_v32, -inf }
 0x116   :  { %125 = vmax.xlane.f32.xlu0 %v124_v33 }
 0x17f   :  { %v171_v35 = vpop.xlane.xlu1 %170 }
 0x180   :  { %v175_v37 = vsub.f32 %v111_v24, %v171_v35 }
 0x181   :  { %v123_v38 = vpop.xlane.xlu0 %122 }
 0x182   :  { %v177_v39 = vmul.f32 1.442695, %v175_v37  ;;  %vm129_vm3 = vcmp.ge.f32.partialorder %v118_v26, %v123_v38 }
 0x183   :  { %v131_v40 = vsel %vm129_vm3, %v548_v36, 16 }
 0x184   :  { %385 = vpow2.f32 %v177_v39  ;;  %v133_v41 = vsel %vm120_vm2, %v131_v40, 2147483647 }
 0x185   :  { %v135_v42 = vshra.s32 %v133_v41, 16  ;;  %v134_v56 = vand.u32 65535, %v133_v41 }
 0x187   :  { %v174_v43 = vpop.xlane.xlu1 %173  ;;  %v137_v44 = vcvt.s32.f32 %v135_v42  ;;  %v136_v58 = vcvt.s32.f32 %v134_v56 }
 0x188   :  { %v176_v45 = vsub.f32 %v114_v30, %v174_v43 }
 0x189   :  { %138 = vmin.xlane.f32.xlu2 %v137_v44  ;;  %v126_v46 = vpop.xlane.xlu0 %125 }
 0x18a   :  { %v552_v47 = vpop.eup %385  ;;  %v179_v48 = vmul.f32 1.442695, %v176_v45  ;;  %vm130_vm4 = vcmp.ge.f32.partialorder %v119_v32, %v126_v46 }
 0x18b   :  { %v132_v49 = vsel %vm130_vm4, %v548_v36, 16  ;;  %v181_v50 = vsel %vm120_vm2, %v552_v47, 0.0  ;;  %vm272_vm4 = vcmp.gt.f32.partialorder %v511_v17, 0.0 }
 0x18c   :  { %387 = vpow2.f32 %v179_v48  ;;  %v148_v51 = vsel %vm120_vm2, %v132_v49, 2147483647  ;;  %182 = vadd.xlane.f32.xlu0 %v181_v50  ;;  %v26_v49 = vmul.f32 %v482_v7, %v482_v7 }
 0x18d   :  { %v150_v52 = vshra.s32 %v148_v51, 16  ;;  %v149_v60 = vand.u32 65535, %v148_v51 }
 0x18e   :  { %v29_v50 = vsel %vm28_vm0, %v26_v49, 0.0  ;;  %vm311_vm0 = vcmp.eq.s32.totalorder %v548_v36, 1 }
 0x18f   :  { %v152_v53 = vcvt.s32.f32 %v150_v52  ;;  %v151_v62 = vcvt.s32.f32 %v149_v60  ;;  %v369_v52 = vsel %vm272_vm4, 1.0, %v419_v31 }
 0x191   :  { %153 = vmin.xlane.f32.xlu2 %v152_v53 }
 0x192   :  { %v558_v54 = vpop.eup %387 }
 0x193   :  { %v184_v55 = vsel %vm120_vm2, %v558_v54, 0.0 }
 0x194   :  { %185 = vadd.xlane.f32.xlu1 %v184_v55 }
 0x19c   :  { %30 = vadd.xlane.f32.xlu1 %v29_v50 }
 0x1fc   :  { %v139_v57 = vpop.xlane.xlu2 %138 }
 0x1fd   :  { %vm140_vm5 = vcmp.eq.f32.partialorder %v137_v44, %v139_v57  ;;  %v145_v15 = vcvt.f32.s32 %v139_v57 }
 0x1fe   :  { %v141_v59 = vsel %vm140_vm5, %v136_v58, inf  ;;  %vm273_vm5 = vcmp.gt.f32.partialorder %v515_v20, 0.0 }
 0x1ff   :  { %142 = vmin.xlane.f32.xlu2 %v141_v59  ;;  %v183_v1 = vpop.xlane.xlu0 %182  ;;  %v146_v22 = vshll.u32 %v145_v15, 16  ;;  %v370_v57 = vsel %vm273_vm5, 1.0, %v419_v31 }
 0x200   :  { %389 = vrcp.f32 %v183_v1  ;;  %v198_v14 = vand.u32 2147483648, %v183_v1  ;;  %vm192_vm8 = vweird.f32 %v183_v1  ;;  %v196_v10 = vand.u32 2147483647, %v183_v1 }
 0x202   :  { %v199_v19 = vor.u32 1.1754944e-38, %v198_v14  ;;  %vm197_vm10 = vcmp.eq.f32.partialorder %v196_v10, 8.507059e+37 }
 0x204   :  { %v154_v61 = vpop.xlane.xlu2 %153 }
 0x205   :  { %vm155_vm6 = vcmp.eq.f32.partialorder %v152_v53, %v154_v61  ;;  %v160_v27 = vcvt.f32.s32 %v154_v61 }
 0x206   :  { %v156_v63 = vsel %vm155_vm6, %v151_v62, inf  ;;  %v390_v4 = vpop.eup %389  ;;  %v288_v62 = vmul.f32 %v511_v17, %v511_v17  ;;  %vm316_vm6 = vcmp.eq.s32.totalorder %v548_v36, 2 }
 0x207   :  { %157 = vmin.xlane.f32.xlu0 %v156_v63  ;;  %33 = vadd.xlane.f32.xlu2 %v32_v2  ;;  %v186_v3 = vpop.xlane.xlu1 %185  ;;  %v188_v5 = vmul.f32 %v390_v4, %v183_v1  ;;  %vm193_vm7 = vweird.f32 %v390_v4  ;;  %v161_v38 = vshll.u32 %v160_v27, 16 }
 0x208   :  { %391 = vrcp.f32 %v186_v3  ;;  %vm194_vm9 = vmor %vm192_vm8, %vm193_vm7  ;;  %v213_v28 = vand.u32 2147483648, %v186_v3  ;;  %vm207_vm12 = vweird.f32 %v186_v3  ;;  %v211_v29 = vand.u32 2147483647, %v186_v3 }
 0x209   :  { %v189_v6 = vsub.f32 1.0, %v188_v5  ;;  %v290_v63 = vsel %vm86_vm1, %v288_v62, 0.0  ;;  %vm326_vm7 = vcmp.eq.s32.totalorder %v548_v36, 4 }
 0x20a   :  { %v214_v35 = vor.u32 1.1754944e-38, %v213_v28  ;;  %vm212_vm15 = vcmp.eq.f32.partialorder %v211_v29, 8.507059e+37 }
 0x20b   :  { %v190_v9 = vmul.f32 %v390_v4, %v189_v6 }
 0x20d   :  { %v191_v12 = vadd.f32 %v390_v4, %v190_v9 }
 0x20e   :  { %v392_v8 = vpop.eup %391 }
 0x20f   :  { %v203_v11 = vmul.f32 %v392_v8, %v186_v3  ;;  %v195_v18 = vsel %vm194_vm9, %v390_v4, %v191_v12  ;;  %vm208_vm11 = vweird.f32 %v392_v8  ;;  %v31_v1 = vpop.xlane.xlu1 %30 }
 0x210   :  { %v200_v24 = vsel %vm197_vm10, %v199_v19, %v195_v18  ;;  %vm209_vm14 = vmor %vm207_vm12, %vm208_vm11 }
 0x211   :  { %v204_v13 = vsub.f32 1.0, %v203_v11  ;;  %v201_v30 = vmul.f32 %v552_v47, %v200_v24  ;;  %v289_v47 = vmul.f32 %v515_v20, %v515_v20 }
 0x213   :  { %v205_v16 = vmul.f32 %v392_v8, %v204_v13  ;;  %v293_v48 = vsel %vm86_vm1, %v289_v47, 0.0 }
 0x215   :  { %v206_v25 = vadd.f32 %v392_v8, %v205_v16 }
 0x217   :  { %v210_v34 = vsel %vm209_vm14, %v392_v8, %v206_v25 }
 0x218   :  { %v215_v41 = vsel %vm212_vm15, %v214_v35, %v210_v34 }
 0x219   :  { %v216_v44 = vmul.f32 %v558_v54, %v215_v41 }
 0x272   :  { %v143_v21 = vpop.xlane.xlu2 %142 }
 0x273   :  { %v144_v23 = vcvt.f32.s32 %v143_v21 }
 0x275   :  { %v565_v26 = vadd.s32 %v146_v22, %v144_v23 }
 0x277   :  { %vm163_vm13 = vcmp.eq.s32.totalorder %v548_v36, %v565_v26  ;;  %v327_v27 = vcvt.s32.f32 %v565_v26 }
 0x278   :  { %v357_v32 = vsel %vm163_vm13, 1.0, %v419_v31 }
 0x279   :  { %v217_v33 = vsub.f32 %v201_v30, %v357_v32  ;;  %v329_v32 = vsel %vm326_vm7, %v327_v27, 0.0 }
 0x27a   :  { %v158_v37 = vpop.xlane.xlu0 %157  ;;  %v34_v0 = vpop.xlane.xlu2 %33 }
 0x27b   :  { %v159_v39 = vcvt.f32.s32 %v158_v37  ;;  %367 = vmatmul.msk.f32.vlgmr.msra.gmra.mxu2 %vm120_vm2, %v217_v33  ;;  %v280_v40 = vmul.f32 %v217_v33, %v217_v33 }
 0x27d   :  { %v162_v42 = vadd.s32 %v161_v38, %v159_v39  ;;  %v282_v43 = vsel %vm120_vm2, %v280_v40, 0.0 }
 0x27e   :  { %283 = vadd.xlane.f32.xlu2 %v282_v43 }
 0x27f   :  { %vm164_vm3 = vcmp.eq.s32.totalorder %v548_v36, %v162_v42  ;;  %v328_v13 = vcvt.s32.f32 %v162_v42 }
 0x280   :  { %v358_v45 = vsel %vm164_vm3, 1.0, %v419_v31 }
 0x281   :  { %v218_v46 = vsub.f32 %v216_v44, %v358_v45  ;;  %v330_v21 = vsel %vm326_vm7, %v328_v13, 0.0 }
 0x283   :  { %368 = vmatmul.msk.f32.vlgmr.msra.gmra.mxu3 %vm120_vm2, %v218_v46  ;;  %v281_v59 = vmul.f32 %v218_v46, %v218_v46 }
 0x285   :  { %v285_v7 = vsel %vm120_vm2, %v281_v59, 0.0  ;;  %vm308_vm2 = vcmp.eq.s32.totalorder %v548_v36, 0 }
 0x286   :  { %294 = vadd.xlane.f32.xlu2 %v293_v48 }
 0x2f1   :  { %v284_v20 = vpop.xlane.xlu2 %283 }
 0x2f9   :  { %v295_v3 = vpop.xlane.xlu2 %294 }
 0x2fe   :  { %v266_v51 = vpop.f32.mrf.mxu2 }
 0x2ff   :  { %v278_v53 = vmul.f32 %v369_v52, %v266_v51 }
 0x301   :  { %v296_v54 = vmul.f32 %v278_v53, %v278_v53 }
 0x303   :  { %v298_v55 = vsel %vm86_vm1, %v296_v54, 0.0 }
 0x304   :  { %299 = vadd.xlane.f32.xlu0 %v298_v55 }
 0x306   :  { %v269_v56 = vpop.f32.mrf.mxu3 }
 0x307   :  { %v279_v58 = vmul.f32 %v370_v57, %v269_v56 }
 0x309   :  { %v297_v60 = vmul.f32 %v279_v58, %v279_v58 }
 0x30b   :  { %v301_v61 = vsel %vm86_vm1, %v297_v60, 0.0  ;;  %vm321_vm1 = vcmp.eq.s32.totalorder %v548_v36, 3 }
 0x30c   :  { %286 = vadd.xlane.f32.xlu0 %v285_v7  ;;  %302 = vadd.xlane.f32.xlu1 %v301_v61  ;;  %v322_v30 = vsel %vm321_vm1, %v284_v20, 0.0 }
 0x314   :  { %291 = vadd.xlane.f32.xlu1 %v290_v63 }
 0x377   :  { %v300_v2 = vpop.xlane.xlu0 %299 }
 0x378   :  { %v304_v9 = vmul.f32 %v300_v2, %v31_v1  ;;  %v312_v22 = vsel %vm311_vm0, %v300_v2, 0.0 }
 0x37a   :  { %v309_v10 = vsel %vm308_vm2, %v304_v9, 0.0 }
 0x37b   :  { %v314_v24 = vadd.f32 %v312_v22, %v309_v10 }
 0x37f   :  { %v287_v4 = vpop.xlane.xlu0 %286  ;;  %v303_v5 = vpop.xlane.xlu1 %302 }
 0x380   :  { %v307_v6 = vmul.f32 %v295_v3, %v287_v4  ;;  %v305_v8 = vmul.f32 %v303_v5, %v34_v0  ;;  %v313_v11 = vsel %vm311_vm0, %v303_v5, 0.0  ;;  %v323_v16 = vsel %vm321_vm1, %v287_v4, 0.0 }
 0x382   :  { %v310_v17 = vsel %vm308_vm2, %v305_v8, 0.0  ;;  %v318_v14 = vsel %vm316_vm6, %v307_v6, 0.0 }
 0x383   :  { %v315_v12 = vadd.f32 %v313_v11, %v310_v17 }
 0x385   :  { %v320_v15 = vadd.f32 %v318_v14, %v315_v12 }
 0x387   :  { %v325_v18 = vadd.f32 %v323_v16, %v320_v15  ;;  %v292_v19 = vpop.xlane.xlu1 %291 }
 0x388   :  { %v306_v23 = vmul.f32 %v292_v19, %v284_v20 }
 0x389   :  { %v332_v25 = vadd.f32 %v330_v21, %v325_v18 }
 0x38a   :  { %v317_v28 = vsel %vm316_vm6, %v306_v23, 0.0 }
 0x38b   :  { %334 = vst [vmem:[#allocation2 + $0x8] sm:$0xff] %v332_v25  ;;  %v319_v29 = vadd.f32 %v317_v28, %v314_v24 }
 0x38d   :  { %v324_v31 = vadd.f32 %v322_v30, %v319_v29 }
 0x38f   :  { %v331_v26 = vadd.f32 %v329_v32, %v324_v31 }
 0x391   :  { %333 = vst [vmem:[#allocation2] sm:$0xff] %v331_v26 }
 0x392   :  { %347 = dma.vmem_to_hbm [thread:$0]  %s340_s28, 256, %s342_s7, [#allocation3], %s421_s8, %s421_s8, %s422_s9  }
 0x393   :  { %417 = dma.done.wait [#allocation3], 256  }
 0x394   :  { %418 = vsyncadd [#allocation3], 4294967040 }
 0x395   :  { %352 = vsyncpa [#allocation3], 1 }

</bundles_post_ra>
